<compile_context>
chip_gen: v7x
topology: tpu7x:2x2x1
jax: 0.10.0
libtpu: 0.0.40
codegen_flags: <defaults>
</compile_context>

<pallas_src>
import jax
import jax.numpy as jnp
from jax import lax
from jax.experimental import pallas as pl
from jax.experimental.pallas import tpu as pltpu

# ---------------- model dimensions ----------------
VOCAB = 100
EMB = 32            # embedding_size
HID = 32            # hidden_size
NUM_LABELS = 4
PAD_IDX = 0
BATCH = 2
SEQ = 8

TB = 8              # batch tile (fills the 8-sublane axis; grid axis)
G4 = 4 * HID        # 128 gate lanes (i|f|g|o)
OUT_PAD = 128       # lane-dense logits block, sliced to NUM_LABELS outside

VOCAB_PAD = 104                 # vocab rows padded to a sublane multiple
B1_ROW = VOCAB_PAD              # classifier bias rows inside the f32 slab
B2_ROW = VOCAB_PAD + 1
FSLAB_ROWS = VOCAB_PAD + 8      # 112
WSLAB_ROWS = 2 * HID + OUT_PAD  # 192 (W_hh^T | W1^T pad | W2 padded)


def lstm_classifier_kernel(ids_ref,    # (T*TB, 1) int32  time-major token ids (VMEM)
                           fslab_ref,  # (FSLAB_ROWS, G4) f32  [ptab | b1 | b2]
                           wslab_ref,  # (WSLAB_ROWS, G4) bf16 [W_hh^T | W1^T | W2pad]
                           out_ref):   # (TB, OUT_PAD) f32
    H = HID
    T = ids_ref.shape[0] // TB

    # ---- Fused embedding gather + input projection + LSTM bias --------------
    # ptab row v = E[v] @ W_ih^T + (b_ih + b_hh)  (pre-folded, exact f32, g-gate
    # columns pre-scaled x2).  One-hot MXU matmul == row gather; one MXU call
    # for the whole tile, off the recurrence's critical path.
    ids_col = ids_ref[...]                                          # (T*TB, 1) int32
    onehot = (ids_col ==
              lax.broadcasted_iota(jnp.int32, (T * TB, VOCAB_PAD), 1)
              ).astype(jnp.float32)                                 # (T*TB, VOCAB_PAD)
    xg_all = jnp.dot(onehot, fslab_ref[0:VOCAB_PAD, :],
                     preferred_element_type=jnp.float32)            # (T*TB, 4H) f32

    whh = wslab_ref[0:H, :]                                         # (H, 4H) bf16

    h = jnp.zeros((TB, H), jnp.float32)
    c = jnp.zeros((TB, H), jnp.float32)
    acc = jnp.zeros((TB, H), jnp.float32)

    # Fully static unroll (T=8).  Only h @ W_hh^T sits on the serial chain.
    for t in range(T):
        gates = xg_all[t * TB:(t + 1) * TB, :] + jnp.dot(
            h.astype(jnp.bfloat16), whh, preferred_element_type=jnp.float32)
        # Single EUP push for all four gates:
        #   sigmoid(x) = 0.5*tanh(0.5*x) + 0.5 ; g columns pre-scaled by 2.
        u = jnp.tanh(0.5 * gates)                                   # (TB, 4H)
        i_g = 0.5 * u[:, 0 * H:1 * H] + 0.5
        f_g = 0.5 * u[:, 1 * H:2 * H] + 0.5
        g_g = u[:, 2 * H:3 * H]
        o_g = 0.5 * u[:, 3 * H:4 * H] + 0.5
        c = f_g * c + i_g * g_g
        h = o_g * jnp.tanh(c)
        acc = acc + h

    # AvgPool1d over the full sequence == temporal mean of hidden states
    # (matches PyTorch: no length masking / pack_padded_sequence here).
    pooled = acc * (1.0 / T)                                        # (TB, H) f32
    # Dropout is identity in eval mode.

    # MultiLayerPerceptronClassifier: Linear -> ReLU -> Linear (lane-padded).
    # TODO(synk): MultiLayerPerceptronClassifier source not provided; assuming
    #             a standard 2-layer MLP (hidden->hidden, ReLU, hidden->labels).
    w1 = wslab_ref[H:2 * H, :]                                      # (H, 128) bf16, cols>=H zero
    w2 = wslab_ref[2 * H:2 * H + OUT_PAD, :]                        # (128, 128) bf16, rows>=H zero
    b1 = fslab_ref[B1_ROW:B1_ROW + 1, :]                            # (1, 128) f32
    b2 = fslab_ref[B2_ROW:B2_ROW + 1, :]                            # (1, 128) f32
    z1 = jnp.maximum(
        jnp.dot(pooled.astype(jnp.bfloat16), w1,
                preferred_element_type=jnp.float32) + b1, 0.0)      # (TB, 128)
    logits = jnp.dot(z1.astype(jnp.bfloat16), w2,
                     preferred_element_type=jnp.float32) + b2       # (TB, 128)
    out_ref[...] = logits.astype(out_ref.dtype)                     # lane-dense store


def rnn_text_classifier_forward(input_sequence, params):
    """input_sequence: int32 (B, T). Returns logits (B, NUM_LABELS) in f32."""
    B, T = input_sequence.shape
    assert T == SEQ

    B_pad = pl.cdiv(B, TB) * TB
    n_tiles = B_pad // TB

    ids = input_sequence.astype(jnp.int32)
    if B_pad != B:
        ids = jnp.pad(ids, ((0, B_pad - B), (0, 0)))   # pad rows -> PAD_IDX (0)
    # Time-major flat ids per batch tile: [n, t*TB + b, 0] = token (n*TB+b, t).
    ids_tm = ids.reshape(n_tiles, TB, T).transpose(0, 2, 1).reshape(n_tiles, T * TB, 1)

    kernel = pl.pallas_call(
        lstm_classifier_kernel,
        out_shape=jax.ShapeDtypeStruct((B_pad, OUT_PAD), jnp.float32),
        grid=(n_tiles,),
        in_specs=[
            pl.BlockSpec((pl.Squeezed(), T * TB, 1), lambda b: (b, 0, 0)),
            pl.BlockSpec((FSLAB_ROWS, G4), lambda b: (0, 0)),
            pl.BlockSpec((WSLAB_ROWS, G4), lambda b: (0, 0)),
        ],
        out_specs=pl.BlockSpec((TB, OUT_PAD), lambda b: (b, 0)),
        compiler_params=pltpu.CompilerParams(
            dimension_semantics=("parallel",)),
    )
    out_pad = kernel(ids_tm, params["fslab"], params["wslab"])
    return out_pad[:B, :NUM_LABELS]


def init_params(key):
    ks = jax.random.split(key, 8)
    bound = HID ** -0.5

    emb = jax.random.normal(ks[0], (VOCAB, EMB), jnp.float32)
    emb = emb.at[PAD_IDX].set(0.0)                                  # padding_idx row zeroed

    w_ih = jax.random.uniform(ks[1], (4 * HID, EMB), jnp.float32, -bound, bound)
    w_hh = jax.random.uniform(ks[2], (4 * HID, HID), jnp.float32, -bound, bound)
    b_ih = jax.random.uniform(ks[3], (4 * HID,), jnp.float32, -bound, bound)
    b_hh = jax.random.uniform(ks[4], (4 * HID,), jnp.float32, -bound, bound)

    w1 = jax.random.uniform(ks[5], (HID, HID), jnp.float32, -bound, bound)
    b1 = jnp.zeros((HID,), jnp.float32)
    w2 = jax.random.uniform(ks[6], (NUM_LABELS, HID), jnp.float32, -bound, bound)
    b2 = jnp.zeros((NUM_LABELS,), jnp.float32)

    # g-gate columns (PyTorch i|f|g|o order -> [2H:3H]) pre-scaled by 2 so the
    # kernel evaluates all gates with a single tanh(0.5*x). Exact (power of 2).
    gscale = jnp.ones((4 * HID,), jnp.float32).at[2 * HID:3 * HID].set(2.0)

    # ---- f32 slab: folded gather/projection table + classifier biases ------
    ptab = (emb @ w_ih.T + (b_ih + b_hh)) * gscale[None, :]         # (VOCAB, 4H) exact f32
    fslab = jnp.zeros((FSLAB_ROWS, G4), jnp.float32)
    fslab = fslab.at[:VOCAB, :].set(ptab)
    fslab = fslab.at[B1_ROW, :HID].set(b1)
    fslab = fslab.at[B2_ROW, :NUM_LABELS].set(b2)

    # ---- bf16 slab: W_hh^T | W1^T (lane-padded) | W2 (sublane+lane padded) --
    wslab = jnp.zeros((WSLAB_ROWS, G4), jnp.float32)
    wslab = wslab.at[:HID, :].set(w_hh.T * gscale[None, :])
    wslab = wslab.at[HID:2 * HID, :HID].set(w1.T)
    wslab = wslab.at[2 * HID:2 * HID + HID, :NUM_LABELS].set(w2.T)

    return {
        "fslab": fslab,                                             # (112, 128) f32
        "wslab": wslab.astype(jnp.bfloat16),                        # (192, 128) bf16
        # raw params kept only for the pure-JAX reference check
        "raw": {"embedding": emb, "w_ih": w_ih, "w_hh": w_hh,
                "b_ih": b_ih, "b_hh": b_hh,
                "w1": w1, "b1": b1, "w2": w2, "b2": b2},
    }


def reference_forward(input_sequence, raw):
    """Pure-JAX f32 reference matching the PyTorch module."""
    emb = raw["embedding"][input_sequence]                          # (B, T, EMB)
    B, T = input_sequence.shape
    h = jnp.zeros((B, HID), jnp.float32)
    c = jnp.zeros((B, HID), jnp.float32)
    hs = []
    for t in range(T):
        g = (emb[:, t, :] @ raw["w_ih"].T + raw["b_ih"]
             + h @ raw["w_hh"].T + raw["b_hh"])
        i_g = jax.nn.sigmoid(g[:, :HID])
        f_g = jax.nn.sigmoid(g[:, HID:2 * HID])
        g_g = jnp.tanh(g[:, 2 * HID:3 * HID])
        o_g = jax.nn.sigmoid(g[:, 3 * HID:])
        c = f_g * c + i_g * g_g
        h = o_g * jnp.tanh(c)
        hs.append(h)
    pooled = jnp.mean(jnp.stack(hs, axis=1), axis=1)
    z1 = jax.nn.relu(pooled @ raw["w1"].T + raw["b1"])
    return z1 @ raw["w2"].T + raw["b2"]


if __name__ == "__main__":
    key = jax.random.PRNGKey(0)
    pkey, dkey = jax.random.split(key)
    params = init_params(pkey)

    input_sequence = jax.random.randint(dkey, (BATCH, SEQ), 0, VOCAB, dtype=jnp.int32)

    logits = rnn_text_classifier_forward(input_sequence, params)
    jax.block_until_ready(logits)

    ref = reference_forward(input_sequence, params["raw"])
    assert logits.shape == (BATCH, NUM_LABELS)
    assert logits.dtype == jnp.float32
    assert jnp.allclose(logits, ref, atol=5e-2, rtol=5e-2), (logits, ref)
    print("KERNEL_OK")
</pallas_src>

<mosaic_0001>
module attributes {stable_mosaic.version = 11 : i64} {
  func.func @lstm_classifier_kernel(%arg0: i32, %arg1: memref<1x64x1xi32, #tpu.memory_space<vmem>>, %arg2: memref<112x128xf32, #tpu.memory_space<vmem>>, %arg3: memref<192x128xbf16, #tpu.memory_space<vmem>>, %arg4: memref<8x128xf32, #tpu.memory_space<vmem>>) attributes {dimension_semantics = [#tpu.dimension_semantics<parallel>], iteration_bounds = array<i64: 1>, scalar_prefetch = 0 : i64, scratch_operands = 0 : i64, tpu.core_type = #tpu.core_type<tc>, window_params = [{transform_indices = @transform_0, window_bounds = array<i64: 1, 64, 1>}, {pipeline_mode = #tpu.pipeline_mode<synchronous>, transform_indices = @transform_1, window_bounds = array<i64: 112, 128>}, {pipeline_mode = #tpu.pipeline_mode<synchronous>, transform_indices = @transform_2, window_bounds = array<i64: 192, 128>}, {transform_indices = @transform_3, window_bounds = array<i64: 8, 128>}]} {
    %c0 = arith.constant 0 : index
    %c0_0 = arith.constant 0 : index
    %c0_1 = arith.constant 0 : index
    %0 = vector.load %arg1[%c0, %c0_0, %c0_1] : memref<1x64x1xi32, #tpu.memory_space<vmem>>, vector<1x64x1xi32>
    %1 = vector.shape_cast %0 : vector<1x64x1xi32> to vector<64x1xi32>
    %2 = tpu.iota {dimensions = array<i32: 1>} : vector<64x104xi32>
    %3 = vector.broadcast %1 : vector<64x1xi32> to vector<64x104xi32>
    %4 = arith.cmpi eq, %3, %2 : vector<64x104xi32>
    %5 = arith.extui %4 : vector<64x104xi1> to vector<64x104xi32>
    %6 = arith.sitofp %5 : vector<64x104xi32> to vector<64x104xf32>
    %c0_2 = arith.constant 0 : index
    %c0_3 = arith.constant 0 : index
    %7 = vector.load %arg2[%c0_2, %c0_3] : memref<112x128xf32, #tpu.memory_space<vmem>>, vector<104x128xf32>
    %cst = arith.constant dense<0.000000e+00> : vector<64x128xf32>
    %8 = tpu.matmul %6, %7, %cst {dimension_numbers = #tpu.dot_dimension_numbers<[1], [0], [0], [1], [0, 0, 1, 1], [], []>} : vector<64x104xf32>, vector<104x128xf32>, vector<64x128xf32> -> vector<64x128xf32>
    %c0_4 = arith.constant 0 : index
    %c0_5 = arith.constant 0 : index
    %9 = vector.load %arg3[%c0_4, %c0_5] : memref<192x128xbf16, #tpu.memory_space<vmem>>, vector<32x128xbf16>
    %cst_6 = arith.constant 0.000000e+00 : f32
    %10 = vector.broadcast %cst_6 : f32 to vector<8x32xf32>
    %cst_7 = arith.constant 0.000000e+00 : f32
    %11 = vector.broadcast %cst_7 : f32 to vector<8x32xf32>
    %cst_8 = arith.constant 0.000000e+00 : f32
    %12 = vector.broadcast %cst_8 : f32 to vector<8x32xf32>
    %13 = vector.extract_strided_slice %8 {offsets = [0, 0], sizes = [8, 128], strides = [1, 1]} : vector<64x128xf32> to vector<8x128xf32>
    %14 = arith.truncf %10 : vector<8x32xf32> to vector<8x32xbf16>
    %cst_9 = arith.constant dense<0.000000e+00> : vector<8x128xf32>
    %15 = tpu.matmul %14, %9, %cst_9 {dimension_numbers = #tpu.dot_dimension_numbers<[1], [0], [0], [1], [0, 0, 1, 1], [], []>} : vector<8x32xbf16>, vector<32x128xbf16>, vector<8x128xf32> -> vector<8x128xf32>
    %16 = arith.addf %13, %15 : vector<8x128xf32>
    %cst_10 = arith.constant 5.000000e-01 : f32
    %17 = vector.broadcast %cst_10 : f32 to vector<8x128xf32>
    %18 = arith.mulf %17, %16 : vector<8x128xf32>
    %19 = math.tanh %18 : vector<8x128xf32>
    %20 = vector.extract_strided_slice %19 {offsets = [0, 0], sizes = [8, 32], strides = [1, 1]} : vector<8x128xf32> to vector<8x32xf32>
    %cst_11 = arith.constant 5.000000e-01 : f32
    %21 = vector.broadcast %cst_11 : f32 to vector<8x32xf32>
    %22 = arith.mulf %21, %20 : vector<8x32xf32>
    %cst_12 = arith.constant 5.000000e-01 : f32
    %23 = vector.broadcast %cst_12 : f32 to vector<8x32xf32>
    %24 = arith.addf %22, %23 : vector<8x32xf32>
    %25 = vector.extract_strided_slice %19 {offsets = [0, 32], sizes = [8, 32], strides = [1, 1]} : vector<8x128xf32> to vector<8x32xf32>
    %cst_13 = arith.constant 5.000000e-01 : f32
    %26 = vector.broadcast %cst_13 : f32 to vector<8x32xf32>
    %27 = arith.mulf %26, %25 : vector<8x32xf32>
    %cst_14 = arith.constant 5.000000e-01 : f32
    %28 = vector.broadcast %cst_14 : f32 to vector<8x32xf32>
    %29 = arith.addf %27, %28 : vector<8x32xf32>
    %30 = vector.extract_strided_slice %19 {offsets = [0, 64], sizes = [8, 32], strides = [1, 1]} : vector<8x128xf32> to vector<8x32xf32>
    %31 = vector.extract_strided_slice %19 {offsets = [0, 96], sizes = [8, 32], strides = [1, 1]} : vector<8x128xf32> to vector<8x32xf32>
    %cst_15 = arith.constant 5.000000e-01 : f32
    %32 = vector.broadcast %cst_15 : f32 to vector<8x32xf32>
    %33 = arith.mulf %32, %31 : vector<8x32xf32>
    %cst_16 = arith.constant 5.000000e-01 : f32
    %34 = vector.broadcast %cst_16 : f32 to vector<8x32xf32>
    %35 = arith.addf %33, %34 : vector<8x32xf32>
    %36 = arith.mulf %29, %11 : vector<8x32xf32>
    %37 = arith.mulf %24, %30 : vector<8x32xf32>
    %38 = arith.addf %36, %37 : vector<8x32xf32>
    %39 = math.tanh %38 : vector<8x32xf32>
    %40 = arith.mulf %35, %39 : vector<8x32xf32>
    %41 = arith.addf %12, %40 : vector<8x32xf32>
    %42 = vector.extract_strided_slice %8 {offsets = [8, 0], sizes = [8, 128], strides = [1, 1]} : vector<64x128xf32> to vector<8x128xf32>
    %43 = arith.truncf %40 : vector<8x32xf32> to vector<8x32xbf16>
    %cst_17 = arith.constant dense<0.000000e+00> : vector<8x128xf32>
    %44 = tpu.matmul %43, %9, %cst_17 {dimension_numbers = #tpu.dot_dimension_numbers<[1], [0], [0], [1], [0, 0, 1, 1], [], []>} : vector<8x32xbf16>, vector<32x128xbf16>, vector<8x128xf32> -> vector<8x128xf32>
    %45 = arith.addf %42, %44 : vector<8x128xf32>
    %cst_18 = arith.constant 5.000000e-01 : f32
    %46 = vector.broadcast %cst_18 : f32 to vector<8x128xf32>
    %47 = arith.mulf %46, %45 : vector<8x128xf32>
    %48 = math.tanh %47 : vector<8x128xf32>
    %49 = vector.extract_strided_slice %48 {offsets = [0, 0], sizes = [8, 32], strides = [1, 1]} : vector<8x128xf32> to vector<8x32xf32>
    %cst_19 = arith.constant 5.000000e-01 : f32
    %50 = vector.broadcast %cst_19 : f32 to vector<8x32xf32>
    %51 = arith.mulf %50, %49 : vector<8x32xf32>
    %cst_20 = arith.constant 5.000000e-01 : f32
    %52 = vector.broadcast %cst_20 : f32 to vector<8x32xf32>
    %53 = arith.addf %51, %52 : vector<8x32xf32>
    %54 = vector.extract_strided_slice %48 {offsets = [0, 32], sizes = [8, 32], strides = [1, 1]} : vector<8x128xf32> to vector<8x32xf32>
    %cst_21 = arith.constant 5.000000e-01 : f32
    %55 = vector.broadcast %cst_21 : f32 to vector<8x32xf32>
    %56 = arith.mulf %55, %54 : vector<8x32xf32>
    %cst_22 = arith.constant 5.000000e-01 : f32
    %57 = vector.broadcast %cst_22 : f32 to vector<8x32xf32>
    %58 = arith.addf %56, %57 : vector<8x32xf32>
    %59 = vector.extract_strided_slice %48 {offsets = [0, 64], sizes = [8, 32], strides = [1, 1]} : vector<8x128xf32> to vector<8x32xf32>
    %60 = vector.extract_strided_slice %48 {offsets = [0, 96], sizes = [8, 32], strides = [1, 1]} : vector<8x128xf32> to vector<8x32xf32>
    %cst_23 = arith.constant 5.000000e-01 : f32
    %61 = vector.broadcast %cst_23 : f32 to vector<8x32xf32>
    %62 = arith.mulf %61, %60 : vector<8x32xf32>
    %cst_24 = arith.constant 5.000000e-01 : f32
    %63 = vector.broadcast %cst_24 : f32 to vector<8x32xf32>
    %64 = arith.addf %62, %63 : vector<8x32xf32>
    %65 = arith.mulf %58, %38 : vector<8x32xf32>
    %66 = arith.mulf %53, %59 : vector<8x32xf32>
    %67 = arith.addf %65, %66 : vector<8x32xf32>
    %68 = math.tanh %67 : vector<8x32xf32>
    %69 = arith.mulf %64, %68 : vector<8x32xf32>
    %70 = arith.addf %41, %69 : vector<8x32xf32>
    %71 = vector.extract_strided_slice %8 {offsets = [16, 0], sizes = [8, 128], strides = [1, 1]} : vector<64x128xf32> to vector<8x128xf32>
    %72 = arith.truncf %69 : vector<8x32xf32> to vector<8x32xbf16>
    %cst_25 = arith.constant dense<0.000000e+00> : vector<8x128xf32>
    %73 = tpu.matmul %72, %9, %cst_25 {dimension_numbers = #tpu.dot_dimension_numbers<[1], [0], [0], [1], [0, 0, 1, 1], [], []>} : vector<8x32xbf16>, vector<32x128xbf16>, vector<8x128xf32> -> vector<8x128xf32>
    %74 = arith.addf %71, %73 : vector<8x128xf32>
    %cst_26 = arith.constant 5.000000e-01 : f32
    %75 = vector.broadcast %cst_26 : f32 to vector<8x128xf32>
    %76 = arith.mulf %75, %74 : vector<8x128xf32>
    %77 = math.tanh %76 : vector<8x128xf32>
    %78 = vector.extract_strided_slice %77 {offsets = [0, 0], sizes = [8, 32], strides = [1, 1]} : vector<8x128xf32> to vector<8x32xf32>
    %cst_27 = arith.constant 5.000000e-01 : f32
    %79 = vector.broadcast %cst_27 : f32 to vector<8x32xf32>
    %80 = arith.mulf %79, %78 : vector<8x32xf32>
    %cst_28 = arith.constant 5.000000e-01 : f32
    %81 = vector.broadcast %cst_28 : f32 to vector<8x32xf32>
    %82 = arith.addf %80, %81 : vector<8x32xf32>
    %83 = vector.extract_strided_slice %77 {offsets = [0, 32], sizes = [8, 32], strides = [1, 1]} : vector<8x128xf32> to vector<8x32xf32>
    %cst_29 = arith.constant 5.000000e-01 : f32
    %84 = vector.broadcast %cst_29 : f32 to vector<8x32xf32>
    %85 = arith.mulf %84, %83 : vector<8x32xf32>
    %cst_30 = arith.constant 5.000000e-01 : f32
    %86 = vector.broadcast %cst_30 : f32 to vector<8x32xf32>
    %87 = arith.addf %85, %86 : vector<8x32xf32>
    %88 = vector.extract_strided_slice %77 {offsets = [0, 64], sizes = [8, 32], strides = [1, 1]} : vector<8x128xf32> to vector<8x32xf32>
    %89 = vector.extract_strided_slice %77 {offsets = [0, 96], sizes = [8, 32], strides = [1, 1]} : vector<8x128xf32> to vector<8x32xf32>
    %cst_31 = arith.constant 5.000000e-01 : f32
    %90 = vector.broadcast %cst_31 : f32 to vector<8x32xf32>
    %91 = arith.mulf %90, %89 : vector<8x32xf32>
    %cst_32 = arith.constant 5.000000e-01 : f32
    %92 = vector.broadcast %cst_32 : f32 to vector<8x32xf32>
    %93 = arith.addf %91, %92 : vector<8x32xf32>
    %94 = arith.mulf %87, %67 : vector<8x32xf32>
    %95 = arith.mulf %82, %88 : vector<8x32xf32>
    %96 = arith.addf %94, %95 : vector<8x32xf32>
    %97 = math.tanh %96 : vector<8x32xf32>
    %98 = arith.mulf %93, %97 : vector<8x32xf32>
    %99 = arith.addf %70, %98 : vector<8x32xf32>
    %100 = vector.extract_strided_slice %8 {offsets = [24, 0], sizes = [8, 128], strides = [1, 1]} : vector<64x128xf32> to vector<8x128xf32>
    %101 = arith.truncf %98 : vector<8x32xf32> to vector<8x32xbf16>
    %cst_33 = arith.constant dense<0.000000e+00> : vector<8x128xf32>
    %102 = tpu.matmul %101, %9, %cst_33 {dimension_numbers = #tpu.dot_dimension_numbers<[1], [0], [0], [1], [0, 0, 1, 1], [], []>} : vector<8x32xbf16>, vector<32x128xbf16>, vector<8x128xf32> -> vector<8x128xf32>
    %103 = arith.addf %100, %102 : vector<8x128xf32>
    %cst_34 = arith.constant 5.000000e-01 : f32
    %104 = vector.broadcast %cst_34 : f32 to vector<8x128xf32>
    %105 = arith.mulf %104, %103 : vector<8x128xf32>
    %106 = math.tanh %105 : vector<8x128xf32>
    %107 = vector.extract_strided_slice %106 {offsets = [0, 0], sizes = [8, 32], strides = [1, 1]} : vector<8x128xf32> to vector<8x32xf32>
    %cst_35 = arith.constant 5.000000e-01 : f32
    %108 = vector.broadcast %cst_35 : f32 to vector<8x32xf32>
    %109 = arith.mulf %108, %107 : vector<8x32xf32>
    %cst_36 = arith.constant 5.000000e-01 : f32
    %110 = vector.broadcast %cst_36 : f32 to vector<8x32xf32>
    %111 = arith.addf %109, %110 : vector<8x32xf32>
    %112 = vector.extract_strided_slice %106 {offsets = [0, 32], sizes = [8, 32], strides = [1, 1]} : vector<8x128xf32> to vector<8x32xf32>
    %cst_37 = arith.constant 5.000000e-01 : f32
    %113 = vector.broadcast %cst_37 : f32 to vector<8x32xf32>
    %114 = arith.mulf %113, %112 : vector<8x32xf32>
    %cst_38 = arith.constant 5.000000e-01 : f32
    %115 = vector.broadcast %cst_38 : f32 to vector<8x32xf32>
    %116 = arith.addf %114, %115 : vector<8x32xf32>
    %117 = vector.extract_strided_slice %106 {offsets = [0, 64], sizes = [8, 32], strides = [1, 1]} : vector<8x128xf32> to vector<8x32xf32>
    %118 = vector.extract_strided_slice %106 {offsets = [0, 96], sizes = [8, 32], strides = [1, 1]} : vector<8x128xf32> to vector<8x32xf32>
    %cst_39 = arith.constant 5.000000e-01 : f32
    %119 = vector.broadcast %cst_39 : f32 to vector<8x32xf32>
    %120 = arith.mulf %119, %118 : vector<8x32xf32>
    %cst_40 = arith.constant 5.000000e-01 : f32
    %121 = vector.broadcast %cst_40 : f32 to vector<8x32xf32>
    %122 = arith.addf %120, %121 : vector<8x32xf32>
    %123 = arith.mulf %116, %96 : vector<8x32xf32>
    %124 = arith.mulf %111, %117 : vector<8x32xf32>
    %125 = arith.addf %123, %124 : vector<8x32xf32>
    %126 = math.tanh %125 : vector<8x32xf32>
    %127 = arith.mulf %122, %126 : vector<8x32xf32>
    %128 = arith.addf %99, %127 : vector<8x32xf32>
    %129 = vector.extract_strided_slice %8 {offsets = [32, 0], sizes = [8, 128], strides = [1, 1]} : vector<64x128xf32> to vector<8x128xf32>
    %130 = arith.truncf %127 : vector<8x32xf32> to vector<8x32xbf16>
    %cst_41 = arith.constant dense<0.000000e+00> : vector<8x128xf32>
    %131 = tpu.matmul %130, %9, %cst_41 {dimension_numbers = #tpu.dot_dimension_numbers<[1], [0], [0], [1], [0, 0, 1, 1], [], []>} : vector<8x32xbf16>, vector<32x128xbf16>, vector<8x128xf32> -> vector<8x128xf32>
    %132 = arith.addf %129, %131 : vector<8x128xf32>
    %cst_42 = arith.constant 5.000000e-01 : f32
    %133 = vector.broadcast %cst_42 : f32 to vector<8x128xf32>
    %134 = arith.mulf %133, %132 : vector<8x128xf32>
    %135 = math.tanh %134 : vector<8x128xf32>
    %136 = vector.extract_strided_slice %135 {offsets = [0, 0], sizes = [8, 32], strides = [1, 1]} : vector<8x128xf32> to vector<8x32xf32>
    %cst_43 = arith.constant 5.000000e-01 : f32
    %137 = vector.broadcast %cst_43 : f32 to vector<8x32xf32>
    %138 = arith.mulf %137, %136 : vector<8x32xf32>
    %cst_44 = arith.constant 5.000000e-01 : f32
    %139 = vector.broadcast %cst_44 : f32 to vector<8x32xf32>
    %140 = arith.addf %138, %139 : vector<8x32xf32>
    %141 = vector.extract_strided_slice %135 {offsets = [0, 32], sizes = [8, 32], strides = [1, 1]} : vector<8x128xf32> to vector<8x32xf32>
    %cst_45 = arith.constant 5.000000e-01 : f32
    %142 = vector.broadcast %cst_45 : f32 to vector<8x32xf32>
    %143 = arith.mulf %142, %141 : vector<8x32xf32>
    %cst_46 = arith.constant 5.000000e-01 : f32
    %144 = vector.broadcast %cst_46 : f32 to vector<8x32xf32>
    %145 = arith.addf %143, %144 : vector<8x32xf32>
    %146 = vector.extract_strided_slice %135 {offsets = [0, 64], sizes = [8, 32], strides = [1, 1]} : vector<8x128xf32> to vector<8x32xf32>
    %147 = vector.extract_strided_slice %135 {offsets = [0, 96], sizes = [8, 32], strides = [1, 1]} : vector<8x128xf32> to vector<8x32xf32>
    %cst_47 = arith.constant 5.000000e-01 : f32
    %148 = vector.broadcast %cst_47 : f32 to vector<8x32xf32>
    %149 = arith.mulf %148, %147 : vector<8x32xf32>
    %cst_48 = arith.constant 5.000000e-01 : f32
    %150 = vector.broadcast %cst_48 : f32 to vector<8x32xf32>
    %151 = arith.addf %149, %150 : vector<8x32xf32>
    %152 = arith.mulf %145, %125 : vector<8x32xf32>
    %153 = arith.mulf %140, %146 : vector<8x32xf32>
    %154 = arith.addf %152, %153 : vector<8x32xf32>
    %155 = math.tanh %154 : vector<8x32xf32>
    %156 = arith.mulf %151, %155 : vector<8x32xf32>
    %157 = arith.addf %128, %156 : vector<8x32xf32>
    %158 = vector.extract_strided_slice %8 {offsets = [40, 0], sizes = [8, 128], strides = [1, 1]} : vector<64x128xf32> to vector<8x128xf32>
    %159 = arith.truncf %156 : vector<8x32xf32> to vector<8x32xbf16>
    %cst_49 = arith.constant dense<0.000000e+00> : vector<8x128xf32>
    %160 = tpu.matmul %159, %9, %cst_49 {dimension_numbers = #tpu.dot_dimension_numbers<[1], [0], [0], [1], [0, 0, 1, 1], [], []>} : vector<8x32xbf16>, vector<32x128xbf16>, vector<8x128xf32> -> vector<8x128xf32>
    %161 = arith.addf %158, %160 : vector<8x128xf32>
    %cst_50 = arith.constant 5.000000e-01 : f32
    %162 = vector.broadcast %cst_50 : f32 to vector<8x128xf32>
    %163 = arith.mulf %162, %161 : vector<8x128xf32>
    %164 = math.tanh %163 : vector<8x128xf32>
    %165 = vector.extract_strided_slice %164 {offsets = [0, 0], sizes = [8, 32], strides = [1, 1]} : vector<8x128xf32> to vector<8x32xf32>
    %cst_51 = arith.constant 5.000000e-01 : f32
    %166 = vector.broadcast %cst_51 : f32 to vector<8x32xf32>
    %167 = arith.mulf %166, %165 : vector<8x32xf32>
    %cst_52 = arith.constant 5.000000e-01 : f32
    %168 = vector.broadcast %cst_52 : f32 to vector<8x32xf32>
    %169 = arith.addf %167, %168 : vector<8x32xf32>
    %170 = vector.extract_strided_slice %164 {offsets = [0, 32], sizes = [8, 32], strides = [1, 1]} : vector<8x128xf32> to vector<8x32xf32>
    %cst_53 = arith.constant 5.000000e-01 : f32
    %171 = vector.broadcast %cst_53 : f32 to vector<8x32xf32>
    %172 = arith.mulf %171, %170 : vector<8x32xf32>
    %cst_54 = arith.constant 5.000000e-01 : f32
    %173 = vector.broadcast %cst_54 : f32 to vector<8x32xf32>
    %174 = arith.addf %172, %173 : vector<8x32xf32>
    %175 = vector.extract_strided_slice %164 {offsets = [0, 64], sizes = [8, 32], strides = [1, 1]} : vector<8x128xf32> to vector<8x32xf32>
    %176 = vector.extract_strided_slice %164 {offsets = [0, 96], sizes = [8, 32], strides = [1, 1]} : vector<8x128xf32> to vector<8x32xf32>
    %cst_55 = arith.constant 5.000000e-01 : f32
    %177 = vector.broadcast %cst_55 : f32 to vector<8x32xf32>
    %178 = arith.mulf %177, %176 : vector<8x32xf32>
    %cst_56 = arith.constant 5.000000e-01 : f32
    %179 = vector.broadcast %cst_56 : f32 to vector<8x32xf32>
    %180 = arith.addf %178, %179 : vector<8x32xf32>
    %181 = arith.mulf %174, %154 : vector<8x32xf32>
    %182 = arith.mulf %169, %175 : vector<8x32xf32>
    %183 = arith.addf %181, %182 : vector<8x32xf32>
    %184 = math.tanh %183 : vector<8x32xf32>
    %185 = arith.mulf %180, %184 : vector<8x32xf32>
    %186 = arith.addf %157, %185 : vector<8x32xf32>
    %187 = vector.extract_strided_slice %8 {offsets = [48, 0], sizes = [8, 128], strides = [1, 1]} : vector<64x128xf32> to vector<8x128xf32>
    %188 = arith.truncf %185 : vector<8x32xf32> to vector<8x32xbf16>
    %cst_57 = arith.constant dense<0.000000e+00> : vector<8x128xf32>
    %189 = tpu.matmul %188, %9, %cst_57 {dimension_numbers = #tpu.dot_dimension_numbers<[1], [0], [0], [1], [0, 0, 1, 1], [], []>} : vector<8x32xbf16>, vector<32x128xbf16>, vector<8x128xf32> -> vector<8x128xf32>
    %190 = arith.addf %187, %189 : vector<8x128xf32>
    %cst_58 = arith.constant 5.000000e-01 : f32
    %191 = vector.broadcast %cst_58 : f32 to vector<8x128xf32>
    %192 = arith.mulf %191, %190 : vector<8x128xf32>
    %193 = math.tanh %192 : vector<8x128xf32>
    %194 = vector.extract_strided_slice %193 {offsets = [0, 0], sizes = [8, 32], strides = [1, 1]} : vector<8x128xf32> to vector<8x32xf32>
    %cst_59 = arith.constant 5.000000e-01 : f32
    %195 = vector.broadcast %cst_59 : f32 to vector<8x32xf32>
    %196 = arith.mulf %195, %194 : vector<8x32xf32>
    %cst_60 = arith.constant 5.000000e-01 : f32
    %197 = vector.broadcast %cst_60 : f32 to vector<8x32xf32>
    %198 = arith.addf %196, %197 : vector<8x32xf32>
    %199 = vector.extract_strided_slice %193 {offsets = [0, 32], sizes = [8, 32], strides = [1, 1]} : vector<8x128xf32> to vector<8x32xf32>
    %cst_61 = arith.constant 5.000000e-01 : f32
    %200 = vector.broadcast %cst_61 : f32 to vector<8x32xf32>
    %201 = arith.mulf %200, %199 : vector<8x32xf32>
    %cst_62 = arith.constant 5.000000e-01 : f32
    %202 = vector.broadcast %cst_62 : f32 to vector<8x32xf32>
    %203 = arith.addf %201, %202 : vector<8x32xf32>
    %204 = vector.extract_strided_slice %193 {offsets = [0, 64], sizes = [8, 32], strides = [1, 1]} : vector<8x128xf32> to vector<8x32xf32>
    %205 = vector.extract_strided_slice %193 {offsets = [0, 96], sizes = [8, 32], strides = [1, 1]} : vector<8x128xf32> to vector<8x32xf32>
    %cst_63 = arith.constant 5.000000e-01 : f32
    %206 = vector.broadcast %cst_63 : f32 to vector<8x32xf32>
    %207 = arith.mulf %206, %205 : vector<8x32xf32>
    %cst_64 = arith.constant 5.000000e-01 : f32
    %208 = vector.broadcast %cst_64 : f32 to vector<8x32xf32>
    %209 = arith.addf %207, %208 : vector<8x32xf32>
    %210 = arith.mulf %203, %183 : vector<8x32xf32>
    %211 = arith.mulf %198, %204 : vector<8x32xf32>
    %212 = arith.addf %210, %211 : vector<8x32xf32>
    %213 = math.tanh %212 : vector<8x32xf32>
    %214 = arith.mulf %209, %213 : vector<8x32xf32>
    %215 = arith.addf %186, %214 : vector<8x32xf32>
    %216 = vector.extract_strided_slice %8 {offsets = [56, 0], sizes = [8, 128], strides = [1, 1]} : vector<64x128xf32> to vector<8x128xf32>
    %217 = arith.truncf %214 : vector<8x32xf32> to vector<8x32xbf16>
    %cst_65 = arith.constant dense<0.000000e+00> : vector<8x128xf32>
    %218 = tpu.matmul %217, %9, %cst_65 {dimension_numbers = #tpu.dot_dimension_numbers<[1], [0], [0], [1], [0, 0, 1, 1], [], []>} : vector<8x32xbf16>, vector<32x128xbf16>, vector<8x128xf32> -> vector<8x128xf32>
    %219 = arith.addf %216, %218 : vector<8x128xf32>
    %cst_66 = arith.constant 5.000000e-01 : f32
    %220 = vector.broadcast %cst_66 : f32 to vector<8x128xf32>
    %221 = arith.mulf %220, %219 : vector<8x128xf32>
    %222 = math.tanh %221 : vector<8x128xf32>
    %223 = vector.extract_strided_slice %222 {offsets = [0, 0], sizes = [8, 32], strides = [1, 1]} : vector<8x128xf32> to vector<8x32xf32>
    %cst_67 = arith.constant 5.000000e-01 : f32
    %224 = vector.broadcast %cst_67 : f32 to vector<8x32xf32>
    %225 = arith.mulf %224, %223 : vector<8x32xf32>
    %cst_68 = arith.constant 5.000000e-01 : f32
    %226 = vector.broadcast %cst_68 : f32 to vector<8x32xf32>
    %227 = arith.addf %225, %226 : vector<8x32xf32>
    %228 = vector.extract_strided_slice %222 {offsets = [0, 32], sizes = [8, 32], strides = [1, 1]} : vector<8x128xf32> to vector<8x32xf32>
    %cst_69 = arith.constant 5.000000e-01 : f32
    %229 = vector.broadcast %cst_69 : f32 to vector<8x32xf32>
    %230 = arith.mulf %229, %228 : vector<8x32xf32>
    %cst_70 = arith.constant 5.000000e-01 : f32
    %231 = vector.broadcast %cst_70 : f32 to vector<8x32xf32>
    %232 = arith.addf %230, %231 : vector<8x32xf32>
    %233 = vector.extract_strided_slice %222 {offsets = [0, 64], sizes = [8, 32], strides = [1, 1]} : vector<8x128xf32> to vector<8x32xf32>
    %234 = vector.extract_strided_slice %222 {offsets = [0, 96], sizes = [8, 32], strides = [1, 1]} : vector<8x128xf32> to vector<8x32xf32>
    %cst_71 = arith.constant 5.000000e-01 : f32
    %235 = vector.broadcast %cst_71 : f32 to vector<8x32xf32>
    %236 = arith.mulf %235, %234 : vector<8x32xf32>
    %cst_72 = arith.constant 5.000000e-01 : f32
    %237 = vector.broadcast %cst_72 : f32 to vector<8x32xf32>
    %238 = arith.addf %236, %237 : vector<8x32xf32>
    %239 = arith.mulf %232, %212 : vector<8x32xf32>
    %240 = arith.mulf %227, %233 : vector<8x32xf32>
    %241 = arith.addf %239, %240 : vector<8x32xf32>
    %242 = math.tanh %241 : vector<8x32xf32>
    %243 = arith.mulf %238, %242 : vector<8x32xf32>
    %244 = arith.addf %215, %243 : vector<8x32xf32>
    %cst_73 = arith.constant 1.250000e-01 : f32
    %245 = vector.broadcast %cst_73 : f32 to vector<8x32xf32>
    %246 = arith.mulf %244, %245 : vector<8x32xf32>
    %c32 = arith.constant 32 : index
    %c0_74 = arith.constant 0 : index
    %247 = vector.load %arg3[%c32, %c0_74] : memref<192x128xbf16, #tpu.memory_space<vmem>>, vector<32x128xbf16>
    %c64 = arith.constant 64 : index
    %c0_75 = arith.constant 0 : index
    %248 = vector.load %arg3[%c64, %c0_75] : memref<192x128xbf16, #tpu.memory_space<vmem>>, vector<128x128xbf16>
    %c104 = arith.constant 104 : index
    %c0_76 = arith.constant 0 : index
    %249 = vector.load %arg2[%c104, %c0_76] : memref<112x128xf32, #tpu.memory_space<vmem>>, vector<1x128xf32>
    %c105 = arith.constant 105 : index
    %c0_77 = arith.constant 0 : index
    %250 = vector.load %arg2[%c105, %c0_77] : memref<112x128xf32, #tpu.memory_space<vmem>>, vector<1x128xf32>
    %251 = arith.truncf %246 : vector<8x32xf32> to vector<8x32xbf16>
    %cst_78 = arith.constant dense<0.000000e+00> : vector<8x128xf32>
    %252 = tpu.matmul %251, %247, %cst_78 {dimension_numbers = #tpu.dot_dimension_numbers<[1], [0], [0], [1], [0, 0, 1, 1], [], []>} : vector<8x32xbf16>, vector<32x128xbf16>, vector<8x128xf32> -> vector<8x128xf32>
    %253 = vector.broadcast %249 : vector<1x128xf32> to vector<8x128xf32>
    %254 = arith.addf %252, %253 : vector<8x128xf32>
    %cst_79 = arith.constant 0.000000e+00 : f32
    %255 = vector.broadcast %cst_79 : f32 to vector<8x128xf32>
    %256 = arith.maximumf %254, %255 : vector<8x128xf32>
    %257 = arith.truncf %256 : vector<8x128xf32> to vector<8x128xbf16>
    %cst_80 = arith.constant dense<0.000000e+00> : vector<8x128xf32>
    %258 = tpu.matmul %257, %248, %cst_80 {dimension_numbers = #tpu.dot_dimension_numbers<[1], [0], [0], [1], [0, 0, 1, 1], [], []>} : vector<8x128xbf16>, vector<128x128xbf16>, vector<8x128xf32> -> vector<8x128xf32>
    %259 = vector.broadcast %250 : vector<1x128xf32> to vector<8x128xf32>
    %260 = arith.addf %258, %259 : vector<8x128xf32>
    %c0_81 = arith.constant 0 : index
    %c0_82 = arith.constant 0 : index
    %261 = vector.load %arg4[%c0_81, %c0_82] : memref<8x128xf32, #tpu.memory_space<vmem>>, vector<8x128xf32>
    tpu.vector_store %arg4[%c0_81, %c0_82], %260 {strides = array<i32>} : memref<8x128xf32, #tpu.memory_space<vmem>>, vector<8x128xf32>,
    return
  }
  func.func @transform_0(%arg0: i32) -> (i32, i32, i32) {
    %c0_i32 = arith.constant 0 : i32
    %c0_i32_0 = arith.constant 0 : i32
    %c0_i32_1 = arith.constant 0 : i32
    return %arg0, %c0_i32, %c0_i32_0 : i32, i32, i32
  }
  func.func @transform_1(%arg0: i32) -> (i32, i32) {
    %c0_i32 = arith.constant 0 : i32
    %c0_i32_0 = arith.constant 0 : i32
    %c0_i32_1 = arith.constant 0 : i32
    return %c0_i32, %c0_i32_0 : i32, i32
  }
  func.func @transform_2(%arg0: i32) -> (i32, i32) {
    %c0_i32 = arith.constant 0 : i32
    %c0_i32_0 = arith.constant 0 : i32
    %c0_i32_1 = arith.constant 0 : i32
    return %c0_i32, %c0_i32_0 : i32, i32
  }
  func.func @transform_3(%arg0: i32) -> (i32, i32) {
    %c0_i32 = arith.constant 0 : i32
    %c0_i32_0 = arith.constant 0 : i32
    return %arg0, %c0_i32 : i32, i32
  }
}

</mosaic_0001>

<bundles_post_ra>
// kernel: tpu_custom_call.1
= control target key start
LH: loop header
LB: loop body
LE: loop exit
PB: predicated region body
PF: predicated region fallthrough
CT: control target
= control target key end

     0   :  { %8 = vsyncpa [#allocation3], 0  ;;  %s1623_s0 = inlined_call_operand.vmem [shape: s32[1,64,1], index: 0, kind: input, shape index: {}]   ;;  %s1624_s1 = inlined_call_operand.hbm [shape: f32[112,128], index: 1, kind: input, shape index: {}]   ;;  %s1625_s2 = inlined_call_operand.hbm [shape: bf16[192,128], index: 2, kind: input, shape index: {}]   ;;  %s1626_s3 = inlined_call_operand.hbm [shape: f32[8,128], index: 3, kind: output, shape index: {}]  }
   0x1   :  { %9 = vsyncpa [#allocation6], 0 }
   0x2   :  { %10 = vsyncpa [#allocation4], 0  ;;  %s1393_s12 = smov [#allocation2]   ;;  %s1321_s16 = scalar_lea.hbm %s1624_s1, 1792 }
   0x3   :  { %s18_s13 = sshll.u32 %s1393_s12, 4  ;;  %p1322_p0 = scmp.ne.s32.totalorder %s1624_s1, %s1321_s16  ;;  %s19_s13 = int_to_ptr.vmem [resolvable:$true] %s18_s13 }
   0x4   :  { %p1325_p1 = scmp.lt.u32.totalorder %s1321_s16, %s1624_s1 }
   0x6   :  { %p1327_p2 = pnand %p1325_p1, %p1322_p0 }
   0x8   :  { %1330 = shalt.err (!%p1327_p2)
}
   0x9   :  { %s1331_s21 = scalar_lea.vmem %s19_s13, 1792  ;;  %p1336_p4 = scmp.lt.s32.totalorder %s19_s13, %s19_s13 }
   0xa   :  { %p1332_p3 = scmp.ne.s32.totalorder %s19_s13, %s1331_s21  ;;  %p1337_p5 = scmp.lt.s32.totalorder %s1331_s21, %s1331_s21 }
   0xc   :  { %p1338_p6 = por %p1337_p5, %p1336_p4 }
   0xe   :  { %p1339_p7 = pnand %p1338_p6, %p1332_p3 }
  0x10   :  { %1342 = shalt.err (!%p1339_p7)
}
  0x11   :  { %s1394_s22 = smov 128   ;;  %s1395_s23 = smov 8  }
  0x12   :  { %24 = dma.hbm_to_vmem [thread:$0]  %s1624_s1, 1792, %s19_s13, [#allocation3], %s1394_s22, %s1394_s22, %s1395_s23  }
  0x13   :  { %s1396_s26 = smov [#allocation5]   ;;  %s1343_s30 = scalar_lea.hbm %s1625_s2, 1536 }
  0x14   :  { %s30_s27 = sshll.u32 %s1396_s26, 4  ;;  %p1344_p8 = scmp.ne.s32.totalorder %s1625_s2, %s1343_s30  ;;  %s31_s27 = int_to_ptr.vmem [resolvable:$true] %s30_s27 }
  0x15   :  { %p1347_p9 = scmp.lt.u32.totalorder %s1343_s30, %s1625_s2 }
  0x17   :  { %p1349_p10 = pnand %p1347_p9, %p1344_p8 }
  0x19   :  { %1352 = shalt.err (!%p1349_p10)
}
  0x1a   :  { %s1353_s8 = scalar_lea.vmem %s31_s27, 1536  ;;  %p1358_p12 = scmp.lt.s32.totalorder %s31_s27, %s31_s27 }
  0x1b   :  { %p1354_p11 = scmp.ne.s32.totalorder %s31_s27, %s1353_s8  ;;  %p1359_p13 = scmp.lt.s32.totalorder %s1353_s8, %s1353_s8 }
  0x1d   :  { %p1360_p0 = por %p1359_p13, %p1358_p12 }
  0x1f   :  { %p1361_p1 = pnand %p1360_p0, %p1354_p11 }
  0x21   :  { %1364 = shalt.err (!%p1361_p1)
}
  0x22   :  { %s1397_s1 = smov 64   ;;  %s1398_s9 = smov 4  }
  0x23   :  { %36 = dma.hbm_to_vmem [thread:$0]  %s1625_s2, 1536, %s31_s27, [#allocation6], %s1397_s1, %s1397_s1, %s1398_s9  }
  0x24   :  { %1387 = dma.done.wait [#allocation3], 1792  }
  0x25   :  { %1388 = vsyncadd [#allocation3], 4294965504 }
  0x26   :  { %1389 = dma.done.wait [#allocation6], 1536  }
  0x27   :  { %1390 = vsyncadd [#allocation6], 4294965760  ;;  %v1399_v0 = vmov 0   ;;  %v1400_v1 = vmov 0.0   ;;  %v44_v2 = vld [vmem:[%s1623_s0] sm:$0xff]  ;;  %v103_v4 = vld [vmem:[#allocation2 + $0x8] sm:$0xff]  ;;  %v52_v25 = vlaneseq }
  0x28   :  { %1275 = vset.pattern.permute.xlu0 %v1399_v0  ;;  %1148 = vmatprep.subr.bf16.mxu1 %v1400_v1  ;;  %v102_v3 = vld [vmem:[#allocation2] sm:$0xff]  ;;  %v104_v5 = vld [vmem:[#allocation2 + $0x10] sm:$0xff]  ;;  %v105_v6 = vld [vmem:[#allocation2 + $0x18] sm:$0xff]  ;;  %vm1401_vm0 = vmmov 0   ;;  %vm115_vm1 = vcmask 850944   ;;  %s1402_s15 = smov 32  }
  0x29   :  { %1276 = vset.pattern.permute.xlu1 %v1399_v0  ;;  %55 = vperm.xlu0 %1275, %v44_v2   ;;  %v45_v7 = vld [vmem:[%s1623_s0 + $0x8] sm:$0xff]  ;;  %v1240_v8 = vpack.c.bf16 %v103_v4, %v102_v3  ;;  %v1244_v9 = vpack.c.bf16 %v105_v6, %v104_v5  ;;  %v106_v10 = vld [vmem:[#allocation2 + $0x20] sm:$0xff]  ;;  %v1457_v12 = vld [vmem:[#allocation5] sm:$0xff]   ;;  %v1474_v26 = vand.u32 127, %v52_v25  ;;  %vm261_vm4 = vcmask 261120  }
  0x2a   :  { %v107_v11 = vld [vmem:[#allocation2 + $0x28] sm:$0xff]  ;;  %1152 = vmatprep.mubr.msk.bf16.mxu1 %vm1401_vm0, %v1400_v1  ;;  %v108_v13 = vld [vmem:[#allocation2 + $0x30] sm:$0xff]  ;;  %v109_v15 = vld [vmem:[#allocation2 + $0x38] sm:$0xff]  ;;  %1149 = vmatpush3.bf16.msra.mxu1 %v1457_v12 }
  0x2b   :  { %1241 = vmatprep.subr.bf16.mxu0 %v1240_v8  ;;  %v1248_v14 = vpack.c.bf16 %v107_v11, %v106_v10  ;;  %v1462_v16 = vld [vmem:[#allocation5 + $0x8] sm:$0xff]   ;;  %1150 = vmatprep.subr.bf16.mxu1 %v1400_v1  ;;  %v110_v17 = vld [vmem:[#allocation2 + $0x40] sm:$0xff]  ;;  %v111_v18 = vld [vmem:[#allocation2 + $0x48] sm:$0xff]  ;;  %v1252_v19 = vpack.c.bf16 %v109_v15, %v108_v13 }
  0x2c   :  { %1243 = vmatpush3.bf16.msra.mxu0 %v1240_v8  ;;  %v1256_v20 = vpack.c.bf16 %v111_v18, %v110_v17  ;;  %v112_v21 = vld [vmem:[#allocation2 + $0x50] sm:$0xff]  ;;  %v113_v22 = vld [vmem:[#allocation2 + $0x58] sm:$0xff]  ;;  %v114_v24 = vld [vmem:[#allocation2 + $0x60] sm:$0xff] }
  0x2d   :  { %58 = vperm.xlu0 %1275, %v45_v7   ;;  %1245 = vmatprep.subr.bf16.mxu0 %v1244_v9  ;;  %v1260_v23 = vpack.c.bf16 %v113_v22, %v112_v21  ;;  %v46_v63 = vld [vmem:[%s1623_s0 + $0x10] sm:$0xff]  ;;  %v47_v5 = vld [vmem:[%s1623_s0 + $0x18] sm:$0xff] }
  0x2e   :  { %1151 = vmatpush3.bf16.msra.mxu1 %v1462_v16 }
  0x2f   :  { %1156 = vmatprep.subr.bf16.mxu1 %v1400_v1 }
  0x30   :  { %1247 = vmatpush3.bf16.msra.mxu0 %v1244_v9 }
  0x31   :  { %1249 = vmatprep.subr.bf16.mxu0 %v1248_v14  ;;  %1153 = vmatmul.mubr.bf16.vlgmr.msra.gmra.mrb[0].mxu1 %v1399_v0 }
  0x32   :  { %1157 = vmatpush3.bf16.msra.mxu1 %v1457_v12  ;;  %1160 = vmatprep.mubr.msk.bf16.mxu1 %vm1401_vm0, %v1400_v1 }
  0x33   :  { %1158 = vmatprep.subr.bf16.mxu1 %v1400_v1 }
  0x34   :  { %1251 = vmatpush3.bf16.msra.mxu0 %v1248_v14 }
  0x35   :  { %1253 = vmatprep.subr.bf16.mxu0 %v1252_v19 }
  0x36   :  { %1159 = vmatpush3.bf16.msra.mxu1 %v1462_v16 }
  0x37   :  { %1164 = vmatprep.subr.bf16.mxu1 %v1400_v1 }
  0x38   :  { %1255 = vmatpush3.bf16.msra.mxu0 %v1252_v19 }
  0x39   :  { %1257 = vmatprep.subr.bf16.mxu0 %v1256_v20 }
  0x3c   :  { %1259 = vmatpush3.bf16.msra.mxu0 %v1256_v20 }
  0x3d   :  { %1261 = vmatprep.subr.bf16.mxu0 %v1260_v23 }
  0x40   :  { %1263 = vmatpush3.bf16.msra.mxu0 %v1260_v23 }
  0x41   :  { %1134 = vmatprep.subr.mxu0 %v114_v24 }
  0x44   :  { %1135 = vmatpush3.msra.mxu0 %v114_v24 }
  0x45   :  { %1220 = vmatprep.subr.bf16.mxu0 %v1400_v1 }
  0xa8   :  { %v56_v27 = vpop.permute.xlu0 %55 }
  0xa9   :  { %vm78_vm2 = vcmp.eq.s32.totalorder %v56_v27, %v1474_v26 }
  0xaa   :  { %v1015_v28 = vsel %vm78_vm2, 1.0, %v1400_v1 }
  0xab   :  { %1136 = vmatprep.mubr.msk.f32.mxu0 %vm115_vm1, %v1015_v28 }
  0xac   :  { %v59_v29 = vpop.permute.xlu0 %58 }
  0xad   :  { %vm79_vm3 = vcmp.eq.s32.totalorder %v59_v29, %v1474_v26 }
  0xae   :  { %v1016_v30 = vsel %vm79_vm3, 1.0, %v1400_v1 }
  0xaf   :  { %1137 = vmatmul.mubr.msk.f32.vlgmr.msra.gmra.mrb[0].mxu0 %vm115_vm1, %v1016_v30 }
 0x104   :  { %v299_v31 = vpop.f32.mrb[0].mxu1 }
 0x105   :  { %v1154_v32 = vpop.f32.mrb[1].mxu1 }
 0x106   :  { %v302_v33 = vpop.f32.mrb[2].mxu1 }
 0x107   :  { %v1155_v34 = vpop.f32.mrb[3].mxu1 }
 0x182   :  { %v1138_v35 = vpop.f32.mrb[0].mxu0 }
 0x183   :  { %v206_v36 = vpop.f32.mrb[1].mxu0 }
 0x184   :  { %v305_v37 = vadd.f32 %v299_v31, %v206_v36 }
 0x186   :  { %v306_v38 = vmul.f32 0.5, %v305_v37 }
 0x188   :  { %1289 = vtanh.f32 %v306_v38 }
 0x192   :  { %v1290_v39 = vpop.eup %1289 }
 0x193   :  { %312 = vrot.lane.b32.xlu1 %v1290_v39, %s1397_s1  ;;  %v308_v40 = vmul.f32 0.5, %v1290_v39 }
 0x195   :  { %v309_v41 = vadd.f32 0.5, %v308_v40 }
 0x197   :  { %v310_v44 = vmul.f32 0.0, %v309_v41 }
 0x205   :  { %v313_v42 = vpop.permute.xlu1 %312 }
 0x206   :  { %v315_v43 = vmul.f32 %v313_v42, %v309_v41 }
 0x208   :  { %317 = vrot.lane.b32.xlu1 %v315_v43, %s1402_s15 }
 0x27a   :  { %v318_v45 = vpop.permute.xlu1 %317 }
 0x27b   :  { %v320_v46 = vadd.f32 %v318_v45, %v310_v44 }
 0x27d   :  { %1291 = vtanh.f32 %v320_v46 }
 0x287   :  { %v1292_v47 = vpop.eup %1291 }
 0x288   :  { %323 = vrot.lane.b32.xlu0 %v1292_v47, %s1397_s1 }
 0x2fa   :  { %v324_v48 = vpop.permute.xlu0 %323 }
 0x2fb   :  { %v1485_v49 = vmul.f32 %v324_v48, %v309_v41 }
 0x2fd   :  { %v328_v50 = vpack.c.bf16 %v1485_v49, %v1485_v49 }
 0x2ff   :  { %330 = vrot.lane.b32.xlu1 %v328_v50, %s1402_s15 }
 0x371   :  { %v331_v51 = vpop.permute.xlu1 %330 }
 0x372   :  { %1161 = vmatmul.mubr.msk.bf16.vlgmr.msra.gmra.mrb[4].mxu1 %vm261_vm4, %v331_v51  ;;  %v48_v51 = vld [vmem:[%s1623_s0 + $0x20] sm:$0xff] }
 0x373   :  { %1165 = vmatpush3.bf16.msra.mxu1 %v1457_v12  ;;  %1168 = vmatprep.mubr.msk.bf16.mxu1 %vm1401_vm0, %v1400_v1 }
 0x374   :  { %1166 = vmatprep.subr.bf16.mxu1 %v1400_v1 }
 0x377   :  { %1167 = vmatpush3.bf16.msra.mxu1 %v1462_v16 }
 0x378   :  { %1172 = vmatprep.subr.bf16.mxu1 %v1400_v1 }
 0x445   :  { %v369_v52 = vpop.f32.mrb[4].mxu1 }
 0x446   :  { %v375_v53 = vadd.f32 %v1138_v35, %v369_v52  ;;  %v1162_v54 = vpop.f32.mrb[5].mxu1 }
 0x447   :  { %v372_v55 = vpop.f32.mrb[6].mxu1 }
 0x448   :  { %v376_v56 = vmul.f32 0.5, %v375_v53  ;;  %v1163_v57 = vpop.f32.mrb[7].mxu1 }
 0x44a   :  { %1293 = vtanh.f32 %v376_v56  ;;  %v49_v56 = vld [vmem:[%s1623_s0 + $0x28] sm:$0xff] }
 0x454   :  { %v1294_v58 = vpop.eup %1293 }
 0x455   :  { %382 = vrot.lane.b32.xlu0 %v1294_v58, %s1397_s1  ;;  %v378_v59 = vmul.f32 0.5, %v1294_v58 }
 0x457   :  { %v379_v60 = vadd.f32 0.5, %v378_v59 }
 0x459   :  { %v380_v0 = vmul.f32 %v379_v60, %v320_v46 }
 0x4c7   :  { %v383_v61 = vpop.permute.xlu0 %382 }
 0x4c8   :  { %v385_v62 = vmul.f32 %v383_v61, %v379_v60 }
 0x4ca   :  { %387 = vrot.lane.b32.xlu1 %v385_v62, %s1402_s15 }
 0x4ce   :  { %61 = vperm.xlu1 %1276, %v46_v63  }
 0x53c   :  { %v388_v2 = vpop.permute.xlu1 %387 }
 0x53d   :  { %v390_v3 = vadd.f32 %v388_v2, %v380_v0 }
 0x53f   :  { %1295 = vtanh.f32 %v390_v3 }
 0x549   :  { %v1296_v4 = vpop.eup %1295 }
 0x54a   :  { %393 = vrot.lane.b32.xlu0 %v1296_v4, %s1397_s1 }
 0x54d   :  { %v62_v6 = vpop.permute.xlu1 %61 }
 0x54e   :  { %64 = vperm.xlu0 %1275, %v47_v5   ;;  %vm80_vm5 = vcmp.eq.s32.totalorder %v62_v6, %v1474_v26 }
 0x54f   :  { %v1017_v7 = vsel %vm80_vm5, 1.0, %v1400_v1 }
 0x550   :  { %1139 = vmatprep.mubr.msk.f32.mxu0 %vm115_vm1, %v1017_v7 }
 0x5bc   :  { %v394_v8 = vpop.permute.xlu0 %393 }
 0x5bd   :  { %v396_v9 = vmul.f32 %v394_v8, %v379_v60 }
 0x5bf   :  { %v398_v10 = vpack.c.bf16 %v396_v9, %v396_v9  ;;  %v397_v35 = vadd.f32 %v396_v9, %v1485_v49 }
 0x5c1   :  { %400 = vrot.lane.b32.xlu1 %v398_v10, %s1402_s15 }
 0x5cd   :  { %v65_v11 = vpop.permute.xlu0 %64 }
 0x5ce   :  { %vm81_vm6 = vcmp.eq.s32.totalorder %v65_v11, %v1474_v26 }
 0x5cf   :  { %v1018_v13 = vsel %vm81_vm6, 1.0, %v1400_v1 }
 0x5d0   :  { %1140 = vmatmul.mubr.msk.f32.gmra.mrb[2].mxu0 %vm115_vm1, %v1018_v13 }
 0x633   :  { %v401_v14 = vpop.permute.xlu1 %400 }
 0x634   :  { %1169 = vmatmul.mubr.msk.bf16.vlgmr.msra.gmra.mrb[8].mxu1 %vm261_vm4, %v401_v14 }
 0x635   :  { %1173 = vmatpush3.bf16.msra.mxu1 %v1457_v12  ;;  %1176 = vmatprep.mubr.msk.bf16.mxu1 %vm1401_vm0, %v1400_v1 }
 0x636   :  { %1174 = vmatprep.subr.bf16.mxu1 %v1400_v1 }
 0x639   :  { %1175 = vmatpush3.bf16.msra.mxu1 %v1462_v16 }
 0x63a   :  { %1180 = vmatprep.subr.bf16.mxu1 %v1400_v1 }
 0x6a3   :  { %v1141_v15 = vpop.f32.mrb[2].mxu0 }
 0x6a4   :  { %v216_v17 = vpop.f32.mrb[3].mxu0 }
 0x707   :  { %v439_v18 = vpop.f32.mrb[8].mxu1 }
 0x708   :  { %v445_v19 = vadd.f32 %v439_v18, %v216_v17  ;;  %v1170_v20 = vpop.f32.mrb[9].mxu1 }
 0x709   :  { %v442_v21 = vpop.f32.mrb[10].mxu1 }
 0x70a   :  { %v446_v22 = vmul.f32 0.5, %v445_v19  ;;  %v1171_v23 = vpop.f32.mrb[11].mxu1 }
 0x70c   :  { %1297 = vtanh.f32 %v446_v22 }
 0x716   :  { %v1298_v24 = vpop.eup %1297 }
 0x717   :  { %452 = vrot.lane.b32.xlu0 %v1298_v24, %s1397_s1  ;;  %v448_v25 = vmul.f32 0.5, %v1298_v24 }
 0x719   :  { %v449_v27 = vadd.f32 0.5, %v448_v25 }
 0x71b   :  { %v450_v30 = vmul.f32 %v449_v27, %v390_v3 }
 0x789   :  { %v453_v28 = vpop.permute.xlu0 %452 }
 0x78a   :  { %v455_v29 = vmul.f32 %v453_v28, %v449_v27 }
 0x78c   :  { %457 = vrot.lane.b32.xlu1 %v455_v29, %s1402_s15 }
 0x7fe   :  { %v458_v31 = vpop.permute.xlu1 %457 }
 0x7ff   :  { %v460_v32 = vadd.f32 %v458_v31, %v450_v30 }
 0x801   :  { %1299 = vtanh.f32 %v460_v32 }
 0x80b   :  { %v1300_v33 = vpop.eup %1299 }
 0x80c   :  { %463 = vrot.lane.b32.xlu0 %v1300_v33, %s1397_s1 }
 0x87e   :  { %v464_v34 = vpop.permute.xlu0 %463 }
 0x87f   :  { %v466_v36 = vmul.f32 %v464_v34, %v449_v27 }
 0x881   :  { %v467_v37 = vadd.f32 %v466_v36, %v397_v35  ;;  %v468_v38 = vpack.c.bf16 %v466_v36, %v466_v36 }
 0x883   :  { %470 = vrot.lane.b32.xlu1 %v468_v38, %s1402_s15 }
 0x8f5   :  { %v471_v39 = vpop.permute.xlu1 %470 }
 0x8f6   :  { %1177 = vmatmul.mubr.msk.bf16.vlgmr.msra.gmra.mrb[12].mxu1 %vm261_vm4, %v471_v39  ;;  %v50_v39 = vld [vmem:[%s1623_s0 + $0x30] sm:$0xff] }
 0x8f7   :  { %1181 = vmatpush3.bf16.msra.mxu1 %v1457_v12  ;;  %1184 = vmatprep.mubr.msk.bf16.mxu1 %vm1401_vm0, %v1400_v1 }
 0x8f8   :  { %1182 = vmatprep.subr.bf16.mxu1 %v1400_v1 }
 0x8fb   :  { %1183 = vmatpush3.bf16.msra.mxu1 %v1462_v16 }
 0x8fc   :  { %1188 = vmatprep.subr.bf16.mxu1 %v1400_v1 }
 0x9c9   :  { %v509_v40 = vpop.f32.mrb[12].mxu1 }
 0x9ca   :  { %v515_v41 = vadd.f32 %v1141_v15, %v509_v40  ;;  %v1178_v42 = vpop.f32.mrb[13].mxu1 }
 0x9cb   :  { %v512_v43 = vpop.f32.mrb[14].mxu1 }
 0x9cc   :  { %v516_v44 = vmul.f32 0.5, %v515_v41  ;;  %v1179_v45 = vpop.f32.mrb[15].mxu1 }
 0x9ce   :  { %1301 = vtanh.f32 %v516_v44  ;;  %v51_v44 = vld [vmem:[%s1623_s0 + $0x38] sm:$0xff]  ;;  %s1403_s0 = smov [#allocation7]  }
 0x9cf   :  { %s1005_s28 = sshll.u32 %s1403_s0, 4  ;;  %s1006_s28 = int_to_ptr.vmem [resolvable:$true] %s1005_s28 }
 0x9d0   :  { %s1365_s29 = scalar_lea.vmem %s1006_s28, 128  ;;  %p1370_p3 = scmp.lt.s32.totalorder %s1006_s28, %s1006_s28 }
 0x9d1   :  { %p1366_p2 = scmp.ne.s32.totalorder %s1006_s28, %s1365_s29  ;;  %p1371_p4 = scmp.lt.s32.totalorder %s1365_s29, %s1365_s29 }
 0x9d3   :  { %p1372_p5 = por %p1371_p4, %p1370_p3 }
 0x9d5   :  { %p1373_p6 = pnand %p1372_p5, %p1366_p2 }
 0x9d8   :  { %v1302_v46 = vpop.eup %1301 }
 0x9d9   :  { %522 = vrot.lane.b32.xlu0 %v1302_v46, %s1397_s1  ;;  %v518_v47 = vmul.f32 0.5, %v1302_v46 }
 0x9db   :  { %v519_v48 = vadd.f32 0.5, %v518_v47 }
 0x9dd   :  { %v520_v52 = vmul.f32 %v519_v48, %v460_v32 }
 0xa4b   :  { %v523_v49 = vpop.permute.xlu0 %522 }
 0xa4c   :  { %v525_v50 = vmul.f32 %v523_v49, %v519_v48 }
 0xa4e   :  { %527 = vrot.lane.b32.xlu1 %v525_v50, %s1402_s15 }
 0xa52   :  { %67 = vperm.xlu1 %1276, %v48_v51  }
 0xac0   :  { %v528_v53 = vpop.permute.xlu1 %527 }
 0xac1   :  { %v530_v54 = vadd.f32 %v528_v53, %v520_v52 }
 0xac3   :  { %1303 = vtanh.f32 %v530_v54 }
 0xacd   :  { %v1304_v55 = vpop.eup %1303 }
 0xace   :  { %533 = vrot.lane.b32.xlu0 %v1304_v55, %s1397_s1 }
 0xad1   :  { %v68_v57 = vpop.permute.xlu1 %67 }
 0xad2   :  { %vm82_vm7 = vcmp.eq.s32.totalorder %v68_v57, %v1474_v26  ;;  %70 = vperm.xlu0 %1275, %v49_v56  }
 0xad3   :  { %v1019_v58 = vsel %vm82_vm7, 1.0, %v1400_v1 }
 0xad4   :  { %1142 = vmatprep.mubr.msk.f32.mxu0 %vm115_vm1, %v1019_v58 }
 0xb40   :  { %v534_v59 = vpop.permute.xlu0 %533 }
 0xb41   :  { %v536_v60 = vmul.f32 %v534_v59, %v519_v48 }
 0xb43   :  { %v537_v61 = vadd.f32 %v536_v60, %v467_v37  ;;  %v538_v62 = vpack.c.bf16 %v536_v60, %v536_v60 }
 0xb45   :  { %540 = vrot.lane.b32.xlu1 %v538_v62, %s1402_s15 }
 0xb51   :  { %v71_v63 = vpop.permute.xlu0 %70 }
 0xb52   :  { %vm83_vm8 = vcmp.eq.s32.totalorder %v71_v63, %v1474_v26 }
 0xb53   :  { %v1020_v0 = vsel %vm83_vm8, 1.0, %v1400_v1 }
 0xb54   :  { %1143 = vmatmul.mubr.msk.f32.gmra.mrb[4].mxu0 %vm115_vm1, %v1020_v0 }
 0xbb7   :  { %v541_v2 = vpop.permute.xlu1 %540 }
 0xbb8   :  { %1185 = vmatmul.mubr.msk.bf16.vlgmr.msra.gmra.mrb[16].mxu1 %vm261_vm4, %v541_v2 }
 0xbb9   :  { %1189 = vmatpush3.bf16.msra.mxu1 %v1457_v12  ;;  %1192 = vmatprep.mubr.msk.bf16.mxu1 %vm1401_vm0, %v1400_v1 }
 0xbba   :  { %1190 = vmatprep.subr.bf16.mxu1 %v1400_v1 }
 0xbbd   :  { %1191 = vmatpush3.bf16.msra.mxu1 %v1462_v16 }
 0xbbe   :  { %1196 = vmatprep.subr.bf16.mxu1 %v1400_v1 }
 0xc27   :  { %v1144_v3 = vpop.f32.mrb[4].mxu0 }
 0xc28   :  { %v226_v4 = vpop.f32.mrb[5].mxu0 }
 0xc8b   :  { %v579_v5 = vpop.f32.mrb[16].mxu1 }
 0xc8c   :  { %v585_v6 = vadd.f32 %v579_v5, %v226_v4  ;;  %v1186_v7 = vpop.f32.mrb[17].mxu1 }
 0xc8d   :  { %v582_v8 = vpop.f32.mrb[18].mxu1 }
 0xc8e   :  { %v586_v9 = vmul.f32 0.5, %v585_v6  ;;  %v1187_v10 = vpop.f32.mrb[19].mxu1 }
 0xc90   :  { %1305 = vtanh.f32 %v586_v9 }
 0xc9a   :  { %v1306_v11 = vpop.eup %1305 }
 0xc9b   :  { %592 = vrot.lane.b32.xlu0 %v1306_v11, %s1397_s1  ;;  %v588_v13 = vmul.f32 0.5, %v1306_v11 }
 0xc9d   :  { %v589_v14 = vadd.f32 0.5, %v588_v13 }
 0xc9f   :  { %v590_v18 = vmul.f32 %v589_v14, %v530_v54 }
 0xd0d   :  { %v593_v15 = vpop.permute.xlu0 %592 }
 0xd0e   :  { %v595_v17 = vmul.f32 %v593_v15, %v589_v14 }
 0xd10   :  { %597 = vrot.lane.b32.xlu1 %v595_v17, %s1402_s15 }
 0xd82   :  { %v598_v19 = vpop.permute.xlu1 %597 }
 0xd83   :  { %v600_v20 = vadd.f32 %v598_v19, %v590_v18 }
 0xd85   :  { %1307 = vtanh.f32 %v600_v20 }
 0xd8f   :  { %v1308_v21 = vpop.eup %1307 }
 0xd90   :  { %603 = vrot.lane.b32.xlu0 %v1308_v21, %s1397_s1 }
 0xe02   :  { %v604_v22 = vpop.permute.xlu0 %603 }
 0xe03   :  { %v606_v23 = vmul.f32 %v604_v22, %v589_v14 }
 0xe05   :  { %v607_v24 = vadd.f32 %v606_v23, %v537_v61  ;;  %v608_v25 = vpack.c.bf16 %v606_v23, %v606_v23 }
 0xe07   :  { %610 = vrot.lane.b32.xlu1 %v608_v25, %s1402_s15 }
 0xe79   :  { %v611_v27 = vpop.permute.xlu1 %610 }
 0xe7a   :  { %1193 = vmatmul.mubr.msk.bf16.vlgmr.msra.gmra.mrb[20].mxu1 %vm261_vm4, %v611_v27  ;;  %v1279_v27 = vld [vmem:[#allocation5 + $0x10] sm:$0xff]  }
 0xe7b   :  { %1197 = vmatpush3.bf16.msra.mxu1 %v1457_v12  ;;  %1200 = vmatprep.mubr.msk.bf16.mxu1 %vm1401_vm0, %v1400_v1 }
 0xe7c   :  { %1198 = vmatprep.subr.bf16.mxu1 %v1400_v1 }
 0xe7f   :  { %1199 = vmatpush3.bf16.msra.mxu1 %v1462_v16 }
 0xe80   :  { %1204 = vmatprep.subr.bf16.mxu1 %v1400_v1 }
 0xf4d   :  { %v649_v28 = vpop.f32.mrb[20].mxu1 }
 0xf4e   :  { %v655_v29 = vadd.f32 %v1144_v3, %v649_v28  ;;  %v1194_v30 = vpop.f32.mrb[21].mxu1  ;;  %v1280_v28 = vld [vmem:[#allocation5 + $0x18] sm:$0xff]  }
 0xf4f   :  { %v652_v31 = vpop.f32.mrb[22].mxu1  ;;  %v1281_v30 = vld [vmem:[#allocation5 + $0x20] sm:$0xff]  }
 0xf50   :  { %v656_v32 = vmul.f32 0.5, %v655_v29  ;;  %v1195_v33 = vpop.f32.mrb[23].mxu1  ;;  %1221 = vmatpush3.bf16.msra.mxu0 %v1281_v30  ;;  %v1282_v31 = vld [vmem:[#allocation5 + $0x28] sm:$0xff]  }
 0xf51   :  { %1222 = vmatprep.subr.bf16.mxu0 %v1400_v1 }
 0xf52   :  { %1309 = vtanh.f32 %v656_v32 }
 0xf54   :  { %1223 = vmatpush3.bf16.msra.mxu0 %v1282_v31 }
 0xf55   :  { %1224 = vmatprep.subr.bf16.mxu0 %v1400_v1 }
 0xf5c   :  { %v1310_v34 = vpop.eup %1309 }
 0xf5d   :  { %662 = vrot.lane.b32.xlu0 %v1310_v34, %s1397_s1  ;;  %v658_v35 = vmul.f32 0.5, %v1310_v34  ;;  %v1283_v34 = vld [vmem:[#allocation5 + $0x30] sm:$0xff]  }
 0xf5e   :  { %1225 = vmatpush3.bf16.msra.mxu0 %v1283_v34 }
 0xf5f   :  { %v659_v36 = vadd.f32 0.5, %v658_v35  ;;  %1226 = vmatprep.subr.bf16.mxu0 %v1400_v1 }
 0xf61   :  { %v660_v40 = vmul.f32 %v659_v36, %v600_v20 }
 0xfcf   :  { %v663_v37 = vpop.permute.xlu0 %662 }
 0xfd0   :  { %v665_v38 = vmul.f32 %v663_v37, %v659_v36  ;;  %v1284_v37 = vld [vmem:[#allocation5 + $0x38] sm:$0xff]  }
 0xfd1   :  { %1227 = vmatpush3.bf16.msra.mxu0 %v1284_v37 }
 0xfd2   :  { %667 = vrot.lane.b32.xlu1 %v665_v38, %s1402_s15  ;;  %1228 = vmatprep.subr.bf16.mxu0 %v1400_v1 }
 0xfd6   :  { %73 = vperm.xlu1 %1276, %v50_v39   ;;  %v1285_v39 = vld [vmem:[#allocation5 + $0x40] sm:$0xff]  }
 0xfd7   :  { %1229 = vmatpush3.bf16.msra.mxu0 %v1285_v39 }
 0xfd8   :  { %1230 = vmatprep.subr.bf16.mxu0 %v1400_v1 }
0x1044   :  { %v668_v41 = vpop.permute.xlu1 %667 }
0x1045   :  { %v670_v42 = vadd.f32 %v668_v41, %v660_v40  ;;  %v1286_v40 = vld [vmem:[#allocation5 + $0x48] sm:$0xff]  }
0x1046   :  { %1231 = vmatpush3.bf16.msra.mxu0 %v1286_v40 }
0x1047   :  { %1311 = vtanh.f32 %v670_v42  ;;  %1232 = vmatprep.subr.bf16.mxu0 %v1400_v1 }
0x1051   :  { %v1312_v43 = vpop.eup %1311 }
0x1052   :  { %673 = vrot.lane.b32.xlu0 %v1312_v43, %s1397_s1  ;;  %v1288_v43 = vld [vmem:[#allocation5 + $0x58] sm:$0xff]  }
0x1055   :  { %v74_v45 = vpop.permute.xlu1 %73 }
0x1056   :  { %vm84_vm9 = vcmp.eq.s32.totalorder %v74_v45, %v1474_v26  ;;  %76 = vperm.xlu0 %1275, %v51_v44   ;;  %v1040_v44 = vld [vmem:[#allocation2 + $0x68] ss:$0 sm:$0xff] }
0x1057   :  { %v1021_v46 = vsel %vm84_vm9, 1.0, %v1400_v1 }
0x1058   :  { %1145 = vmatprep.mubr.msk.f32.mxu0 %vm115_vm1, %v1021_v46 }
0x10c4   :  { %v674_v47 = vpop.permute.xlu0 %673 }
0x10c5   :  { %v676_v48 = vmul.f32 %v674_v47, %v659_v36 }
0x10c7   :  { %v677_v49 = vadd.f32 %v676_v48, %v607_v24  ;;  %v678_v50 = vpack.c.bf16 %v676_v48, %v676_v48 }
0x10c9   :  { %680 = vrot.lane.b32.xlu1 %v678_v50, %s1402_s15 }
0x10d5   :  { %v77_v51 = vpop.permute.xlu0 %76 }
0x10d6   :  { %vm85_vm10 = vcmp.eq.s32.totalorder %v77_v51, %v1474_v26 }
0x10d7   :  { %v1022_v52 = vsel %vm85_vm10, 1.0, %v1400_v1 }
0x10d8   :  { %1146 = vmatmul.mubr.msk.f32.gmra.mrb[6].mxu0 %vm115_vm1, %v1022_v52  ;;  %v1044_v52 = vld [vmem:[#allocation2 + $0x69] ss:$0 sm:$0xff] }
0x10d9   :  { %1236 = vmatprep.mubr.msk.bf16.mxu0 %vm1401_vm0, %v1400_v1 }
0x113b   :  { %v681_v53 = vpop.permute.xlu1 %680 }
0x113c   :  { %1201 = vmatmul.mubr.msk.bf16.vlgmr.msra.gmra.mrb[24].mxu1 %vm261_vm4, %v681_v53 }
0x113d   :  { %1205 = vmatpush3.bf16.msra.mxu1 %v1457_v12  ;;  %1208 = vmatprep.mubr.msk.bf16.mxu1 %vm1401_vm0, %v1400_v1 }
0x113e   :  { %1206 = vmatprep.subr.bf16.mxu1 %v1400_v1 }
0x1141   :  { %1207 = vmatpush3.bf16.msra.mxu1 %v1462_v16 }
0x1142   :  { %1212 = vmatprep.subr.bf16.mxu1 %v1400_v1 }
0x11ab   :  { %v1147_v26 = vpop.f32.mrb[6].mxu0 }
0x11ac   :  { %v236_v54 = vpop.f32.mrb[7].mxu0 }
0x120f   :  { %v719_v55 = vpop.f32.mrb[24].mxu1 }
0x1210   :  { %v725_v56 = vadd.f32 %v719_v55, %v236_v54  ;;  %v1202_v57 = vpop.f32.mrb[25].mxu1 }
0x1211   :  { %v722_v58 = vpop.f32.mrb[26].mxu1 }
0x1212   :  { %v726_v59 = vmul.f32 0.5, %v725_v56  ;;  %v1203_v60 = vpop.f32.mrb[27].mxu1 }
0x1214   :  { %1313 = vtanh.f32 %v726_v59 }
0x121e   :  { %v1314_v61 = vpop.eup %1313 }
0x121f   :  { %732 = vrot.lane.b32.xlu0 %v1314_v61, %s1397_s1  ;;  %v728_v12 = vmul.f32 0.5, %v1314_v61 }
0x1221   :  { %v729_v62 = vadd.f32 0.5, %v728_v12 }
0x1223   :  { %v730_v16 = vmul.f32 %v729_v62, %v670_v42  ;;  %v1287_v42 = vld [vmem:[#allocation5 + $0x50] sm:$0xff]  }
0x1224   :  { %1233 = vmatpush3.bf16.msra.mxu0 %v1287_v42 }
0x1225   :  { %1234 = vmatprep.subr.bf16.mxu0 %v1400_v1 }
0x1228   :  { %1235 = vmatpush3.bf16.msra.mxu0 %v1288_v43 }
0x1291   :  { %v733_v63 = vpop.permute.xlu0 %732 }
0x1292   :  { %v735_v0 = vmul.f32 %v733_v63, %v729_v62 }
0x1294   :  { %737 = vrot.lane.b32.xlu1 %v735_v0, %s1402_s15 }
0x1306   :  { %v738_v2 = vpop.permute.xlu1 %737 }
0x1307   :  { %v740_v3 = vadd.f32 %v738_v2, %v730_v16 }
0x1309   :  { %1315 = vtanh.f32 %v740_v3 }
0x1313   :  { %v1316_v4 = vpop.eup %1315 }
0x1314   :  { %743 = vrot.lane.b32.xlu0 %v1316_v4, %s1397_s1 }
0x1386   :  { %v744_v5 = vpop.permute.xlu0 %743 }
0x1387   :  { %v746_v6 = vmul.f32 %v744_v5, %v729_v62 }
0x1389   :  { %v747_v7 = vadd.f32 %v746_v6, %v677_v49  ;;  %v748_v8 = vpack.c.bf16 %v746_v6, %v746_v6 }
0x138b   :  { %750 = vrot.lane.b32.xlu1 %v748_v8, %s1402_s15 }
0x13fd   :  { %v751_v9 = vpop.permute.xlu1 %750 }
0x13fe   :  { %1209 = vmatmul.mubr.msk.bf16.vlgmr.msra.gmra.mrb[28].mxu1 %vm261_vm4, %v751_v9 }
0x13ff   :  { %1216 = vmatprep.mubr.msk.bf16.mxu1 %vm1401_vm0, %v1400_v1  ;;  %1213 = vmatpush3.bf16.msra.mxu1 %v1279_v27 }
0x1400   :  { %1214 = vmatprep.subr.bf16.mxu1 %v1400_v1 }
0x1403   :  { %1215 = vmatpush3.bf16.msra.mxu1 %v1280_v28 }
0x14d1   :  { %v789_v10 = vpop.f32.mrb[28].mxu1 }
0x14d2   :  { %v795_v11 = vadd.f32 %v1147_v26, %v789_v10  ;;  %v1210_v13 = vpop.f32.mrb[29].mxu1 }
0x14d3   :  { %v792_v14 = vpop.f32.mrb[30].mxu1 }
0x14d4   :  { %v796_v15 = vmul.f32 0.5, %v795_v11  ;;  %v1211_v17 = vpop.f32.mrb[31].mxu1 }
0x14d6   :  { %1317 = vtanh.f32 %v796_v15 }
0x14e0   :  { %v1318_v18 = vpop.eup %1317 }
0x14e1   :  { %802 = vrot.lane.b32.xlu0 %v1318_v18, %s1397_s1  ;;  %v798_v19 = vmul.f32 0.5, %v1318_v18 }
0x14e3   :  { %v799_v20 = vadd.f32 0.5, %v798_v19 }
0x14e5   :  { %v800_v23 = vmul.f32 %v799_v20, %v740_v3 }
0x1553   :  { %v803_v21 = vpop.permute.xlu0 %802 }
0x1554   :  { %v805_v22 = vmul.f32 %v803_v21, %v799_v20 }
0x1556   :  { %807 = vrot.lane.b32.xlu1 %v805_v22, %s1402_s15 }
0x15c8   :  { %v808_v24 = vpop.permute.xlu1 %807 }
0x15c9   :  { %v810_v25 = vadd.f32 %v808_v24, %v800_v23 }
0x15cb   :  { %1319 = vtanh.f32 %v810_v25 }
0x15d5   :  { %v1320_v29 = vpop.eup %1319 }
0x15d6   :  { %813 = vrot.lane.b32.xlu0 %v1320_v29, %s1397_s1 }
0x1648   :  { %v814_v32 = vpop.permute.xlu0 %813 }
0x1649   :  { %v816_v33 = vmul.f32 %v814_v32, %v799_v20 }
0x164b   :  { %v817_v35 = vadd.f32 %v816_v33, %v747_v7 }
0x164d   :  { %v818_v36 = vmul.f32 0.125, %v817_v35 }
0x164f   :  { %v841_v38 = vpack.c.bf16 %v818_v36, %v818_v36 }
0x1651   :  { %847 = vrot.lane.b32.xlu1 %v841_v38, %s1402_s15 }
0x16c3   :  { %v848_v41 = vpop.permute.xlu1 %847 }
0x16c4   :  { %1217 = vmatmul.mubr.msk.bf16.vlgmr.msra.gmra.mrb[32].mxu1 %vm261_vm4, %v848_v41 }
0x1797   :  { %v898_v45 = vpop.f32.mrb[32].mxu1 }
0x1798   :  { %v899_v46 = vadd.f32 %v1040_v44, %v898_v45  ;;  %v1218_v47 = vpop.f32.mrb[33].mxu1 }
0x1799   :  { %v901_v48 = vpop.f32.mrb[34].mxu1 }
0x179a   :  { %v904_v49 = vmax.f32 %v899_v46, 0.0  ;;  %v1219_v50 = vpop.f32.mrb[35].mxu1 }
0x179c   :  { %v905_v51 = vpack.c.bf16 %v904_v49, %v904_v49 }
0x179e   :  { %1237 = vmatmul.mubr.bf16.vlgmr.msra.gmra.mrb[8].mxu0 %v905_v51 }
0x1871   :  { %v992_v53 = vpop.f32.mrb[8].mxu0 }
0x1872   :  { %v993_v26 = vadd.f32 %v1044_v52, %v992_v53  ;;  %v1238_v54 = vpop.f32.mrb[9].mxu0 }
0x1873   :  { %v995_v55 = vpop.f32.mrb[10].mxu0 }
0x1874   :  { %998 = vst [vmem:[#allocation7] sm:$0xff] %v993_v26  ;;  %v1239_v1 = vpop.f32.mrb[11].mxu0 }
0x1875   :  { %1376 = shalt.err (!%p1373_p6)
}
0x1876   :  { %s1377_s5 = scalar_lea.hbm %s1626_s3, 128 }
0x1877   :  { %p1378_p7 = scmp.ne.s32.totalorder %s1626_s3, %s1377_s5  ;;  %p1381_p8 = scmp.lt.u32.totalorder %s1377_s5, %s1626_s3 }
0x1879   :  { %p1383_p9 = pnand %p1381_p8, %p1378_p7 }
0x187b   :  { %1386 = shalt.err (!%p1383_p9)
}
0x187c   :  { %1008 = dma.vmem_to_hbm [thread:$0]  %s1006_s28, 128, %s1626_s3, [#allocation4]  }
0x187d   :  { %1391 = dma.done.wait [#allocation4], 128  }
0x187e   :  { %1392 = vsyncadd [#allocation4], 4294967168 }
0x187f   :  { %1012 = vsyncpa [#allocation3], 1 }
0x1880   :  { %1013 = vsyncpa [#allocation6], 1 }
0x1881   :  { %1014 = vsyncpa [#allocation4], 1 }

</bundles_post_ra>
